<compile_context>
chip_gen: v7x
topology: tpu7x:2x2x1
jax: 0.10.0
libtpu: 0.0.40
codegen_flags: <defaults>
</compile_context>

<pallas_src>
import math

import jax
import jax.numpy as jnp
from jax import lax
from jax.experimental import pallas as pl
from jax.experimental.pallas import tpu as pltpu


def _round_up(a, m):
    return ((a + m - 1) // m) * m


def _pick_tile_rows(n_rows, row_width, itemsize, *,
                    target_tile_hbm_bytes=4 << 20,
                    x_vmem_budget_bytes=24 << 20):
    """Rows of the (possibly folded) x matrix per grid step.

    row_width: elements per x row as laid out for the kernel (last dim of the
    x tile).  Targets ~4 MiB of HBM data per step while keeping the
    double-buffered, lane-padded x tiles within `x_vmem_budget_bytes`
    (fits v7x's 64 MiB VMEM as well as v5e/v6e's 128 MiB).
    """
    hbm_row_bytes = max(row_width * itemsize, 1)
    vmem_row_bytes = _round_up(row_width, 128) * itemsize
    rows_target = target_tile_hbm_bytes // hbm_row_bytes
    rows_cap = x_vmem_budget_bytes // (2 * vmem_row_bytes)  # double-buffered
    tile = max(128, (max(128, min(rows_target, rows_cap)) // 128) * 128)
    if n_rows > 128:
        # Keep at least two grid steps so the "parallel" batch axis can split
        # across both TensorCores on v7x (harmless on v5e/v6e).
        tile = min(tile, _round_up((n_rows + 1) // 2, 128))
    else:
        tile = 128  # lane-dense output even for tiny batches
    return tile


def _binclass_kernel(x_ref, w_ref, b_ref, o_ref):
    # x_ref: (TILE, C)    w_ref: (R, C)    b_ref: (1,) f32 in SMEM
    # o_ref: (1, R, TILE) f32  -- lane-dense output (TILE on lanes).
    # z = w @ x^T, expressed as a dot_general contracting the last dims so no
    # explicit transpose of the (TILE, C) tile is traced (MXU handles it).
    z = lax.dot_general(
        w_ref[...], x_ref[...],
        dimension_numbers=(((1,), (1,)), ((), ())),
        preferred_element_type=jnp.float32,
    )
    z = z + b_ref[0]
    # sigmoid(z) = 1/(1+exp(-z)); exp(-z)=inf for z << 0 gives exactly 0.0,
    # which is the correct limit, so the 1e-5 tolerance still holds.
    o_ref[0] = pl.reciprocal(1.0 + jnp.exp(-z), approx=False)


def binclass_forward(x, w, b, *, tile_rows=None, x_dtype=None):
    """sigmoid(x @ w.T + b), matching torch.sigmoid(nn.Linear(D, 1)(x)).

    x: [N, D]; w: [1, D] (PyTorch nn.Linear weight layout); b: [1].
    Returns [N, 1] float32.  `x_dtype=jnp.bfloat16` enables the half-HBM-traffic
    input path (f32 accumulate).  `tile_rows` overrides the per-step row tile of
    the (possibly folded) x matrix; must be a multiple of 128.
    """
    in_dtype = jnp.float32 if x_dtype is None else jnp.dtype(x_dtype)
    x = jnp.asarray(x).astype(in_dtype)
    w = jnp.asarray(w, jnp.float32).reshape(1, -1)
    b = jnp.asarray(b, jnp.float32).reshape(1)
    n, d = x.shape
    assert w.shape[1] == d
    itemsize = jnp.dtype(in_dtype).itemsize

    # Small-D folding: pack `fold` logical rows into one lane-dense VMEM row.
    fold = 128 // d if (d < 128 and 128 % d == 0) else 1
    c = fold * d
    # Block-diagonal replication of w across folds: (fold, fold*d).
    wb = jnp.kron(jnp.eye(fold, dtype=jnp.float32), w).astype(in_dtype)

    n_rows = -(-n // fold)  # folded row count
    tile = _pick_tile_rows(n_rows, c, itemsize) if tile_rows is None else tile_rows
    n_rows_pad = _round_up(n_rows, tile)
    n_pad = n_rows_pad * fold
    if n_pad != n:
        # Padded rows are zeros -> they compute sigmoid(b); sliced off below.
        x = jnp.pad(x, ((0, n_pad - n), (0, 0)))
    xf = x.reshape(n_rows_pad, c)
    num_tiles = n_rows_pad // tile

    # VMEM limit derived from the actual lane-padded, double-buffered buffers.
    c_lanes = _round_up(c, 128)
    x_vmem = 2 * tile * c_lanes * itemsize
    w_vmem = _round_up(fold, 8) * c_lanes * itemsize
    o_vmem = 2 * _round_up(fold, 8) * tile * 4
    vmem_limit = int(min(max(32 << 20, x_vmem + w_vmem + o_vmem + (4 << 20)), 112 << 20))

    cost = pl.CostEstimate(
        flops=2 * n * d,
        transcendentals=n,
        bytes_accessed=int(n * d * itemsize + d * 4 + 4 + n * 4),
    )

    out = pl.pallas_call(
        _binclass_kernel,
        out_shape=jax.ShapeDtypeStruct((num_tiles, fold, tile), jnp.float32),
        grid=(num_tiles,),
        in_specs=[
            pl.BlockSpec((tile, c), lambda i: (i, 0)),           # x row tile (pipelined)
            pl.BlockSpec((fold, c), lambda i: (0, 0)),           # weight block, VMEM-resident
            pl.BlockSpec(memory_space=pltpu.MemorySpace.SMEM),   # bias scalar
        ],
        out_specs=pl.BlockSpec((1, fold, tile), lambda i: (i, 0, 0)),
        compiler_params=pltpu.CompilerParams(
            dimension_semantics=("parallel",),
            vmem_limit_bytes=vmem_limit,
        ),
        cost_estimate=cost,
    )(xf, wb, b)

    # out[t, j, r] holds logical row (t*tile + r)*fold + j.
    return out.transpose(0, 2, 1).reshape(n_pad, 1)[:n]


if __name__ == "__main__":
    key = jax.random.PRNGKey(0)
    kx, kw, kb = jax.random.split(key, 3)

    N, D = 8, 32  # BinClassModel(input_dim=32), batch=8
    x = jax.random.normal(kx, (N, D), dtype=jnp.float32)
    bound = 1.0 / math.sqrt(D)  # nn.Linear default uniform(-1/sqrt(D), 1/sqrt(D))
    w = jax.random.uniform(kw, (1, D), minval=-bound, maxval=bound, dtype=jnp.float32)
    b = jax.random.uniform(kb, (1,), minval=-bound, maxval=bound, dtype=jnp.float32)

    out = jax.block_until_ready(binclass_forward(x, w, b))
    ref = jax.nn.sigmoid(x @ w.T + b[None, :])
    assert out.shape == (N, 1), out.shape
    assert jnp.allclose(out, ref, atol=1e-5, rtol=1e-5)

    # Multi-tile folded path (fold=4, >=2 grid steps -> splits across v7x TCs).
    N2 = 1000
    x2 = jax.random.normal(jax.random.PRNGKey(1), (N2, D), dtype=jnp.float32)
    out2 = jax.block_until_ready(binclass_forward(x2, w, b))
    ref2 = jax.nn.sigmoid(x2 @ w.T + b[None, :])
    assert out2.shape == (N2, 1), out2.shape
    assert jnp.allclose(out2, ref2, atol=1e-5, rtol=1e-5)

    # Unfolded (D >= 128) multi-tile + padded-batch path.
    N3, D3 = 300, 128
    x3 = jax.random.normal(jax.random.PRNGKey(2), (N3, D3), dtype=jnp.float32)
    w3 = jax.random.uniform(jax.random.PRNGKey(3), (1, D3), minval=-bound, maxval=bound,
                            dtype=jnp.float32)
    out3 = jax.block_until_ready(binclass_forward(x3, w3, b, tile_rows=128))
    ref3 = jax.nn.sigmoid(x3 @ w3.T + b[None, :])
    assert out3.shape == (N3, 1), out3.shape
    assert jnp.allclose(out3, ref3, atol=1e-5, rtol=1e-5)

    # Optional bf16 input path (half HBM traffic, f32 accumulate).
    out_bf16 = jax.block_until_ready(binclass_forward(x2, w, b, x_dtype=jnp.bfloat16))
    assert out_bf16.shape == (N2, 1)
    assert jnp.allclose(out_bf16, ref2, atol=2e-2, rtol=2e-2)

    print("KERNEL_OK")
</pallas_src>

<mosaic_0001>
module attributes {stable_mosaic.version = 11 : i64} {
  func.func @_binclass_kernel(%arg0: i32, %arg1: memref<128x128xf32, #tpu.memory_space<vmem>>, %arg2: memref<4x128xf32, #tpu.memory_space<vmem>>, %arg3: memref<1xf32, #tpu.memory_space<smem>>, %arg4: memref<1x4x128xf32, #tpu.memory_space<vmem>>) attributes {dimension_semantics = [#tpu.dimension_semantics<parallel>], iteration_bounds = array<i64: 1>, scalar_prefetch = 0 : i64, scratch_operands = 0 : i64, tpu.core_type = #tpu.core_type<tc>, window_params = [{transform_indices = @transform_0, window_bounds = array<i64: 128, 128>}, {pipeline_mode = #tpu.pipeline_mode<synchronous>, transform_indices = @transform_1, window_bounds = array<i64: 4, 128>}, {transform_indices = @transform_2, window_bounds = array<i64: 1>}, {transform_indices = @transform_3, window_bounds = array<i64: 1, 4, 128>}]} {
    %c0 = arith.constant 0 : index
    %c0_0 = arith.constant 0 : index
    %0 = vector.load %arg2[%c0, %c0_0] : memref<4x128xf32, #tpu.memory_space<vmem>>, vector<4x128xf32>
    %c0_1 = arith.constant 0 : index
    %c0_2 = arith.constant 0 : index
    %1 = vector.load %arg1[%c0_1, %c0_2] : memref<128x128xf32, #tpu.memory_space<vmem>>, vector<128x128xf32>
    %cst = arith.constant dense<0.000000e+00> : vector<4x128xf32>
    %2 = tpu.matmul %0, %1, %cst {dimension_numbers = #tpu.dot_dimension_numbers<[1], [1], [0], [0], [0, 0, 1, 0], [], []>} : vector<4x128xf32>, vector<128x128xf32>, vector<4x128xf32> -> vector<4x128xf32>
    %c0_3 = arith.constant 0 : index
    %3 = memref.load %arg3[%c0_3] : memref<1xf32, #tpu.memory_space<smem>>
    %4 = vector.broadcast %3 : f32 to vector<4x128xf32>
    %5 = arith.addf %2, %4 : vector<4x128xf32>
    %cst_4 = arith.constant 0.000000e+00 : f32
    %6 = vector.broadcast %cst_4 : f32 to vector<4x128xf32>
    %7 = arith.subf %6, %5 : vector<4x128xf32>
    %8 = math.exp %7 : vector<4x128xf32>
    %cst_5 = arith.constant 1.000000e+00 : f32
    %9 = vector.broadcast %cst_5 : f32 to vector<4x128xf32>
    %10 = arith.addf %9, %8 : vector<4x128xf32>
    %11 = tpu.reciprocal %10 : vector<4x128xf32> -> vector<4x128xf32>
    %c0_6 = arith.constant 0 : index
    %c0_7 = arith.constant 0 : index
    %c0_8 = arith.constant 0 : index
    %12 = vector.load %arg4[%c0_6, %c0_7, %c0_8] : memref<1x4x128xf32, #tpu.memory_space<vmem>>, vector<1x4x128xf32>
    %13 = vector.shape_cast %12 : vector<1x4x128xf32> to vector<4x128xf32>
    %14 = vector.shape_cast %11 : vector<4x128xf32> to vector<1x4x128xf32>
    tpu.vector_store %arg4[%c0_6, %c0_7, %c0_8], %14 {strides = array<i32>} : memref<1x4x128xf32, #tpu.memory_space<vmem>>, vector<1x4x128xf32>,
    return
  }
  func.func @transform_0(%arg0: i32) -> (i32, i32) {
    %c0_i32 = arith.constant 0 : i32
    %c0_i32_0 = arith.constant 0 : i32
    return %arg0, %c0_i32 : i32, i32
  }
  func.func @transform_1(%arg0: i32) -> (i32, i32) {
    %c0_i32 = arith.constant 0 : i32
    %c0_i32_0 = arith.constant 0 : i32
    %c0_i32_1 = arith.constant 0 : i32
    return %c0_i32, %c0_i32_0 : i32, i32
  }
  func.func @transform_2(%arg0: i32) -> i32 {
    %c0_i32 = arith.constant 0 : i32
    %c0_i32_0 = arith.constant 0 : i32
    return %c0_i32 : i32
  }
  func.func @transform_3(%arg0: i32) -> (i32, i32, i32) {
    %c0_i32 = arith.constant 0 : i32
    %c0_i32_0 = arith.constant 0 : i32
    %c0_i32_1 = arith.constant 0 : i32
    return %arg0, %c0_i32, %c0_i32_0 : i32, i32, i32
  }
}

</mosaic_0001>

<bundles_post_ra>
// kernel: tpu_custom_call.1
= control target key start
LH: loop header
LB: loop body
LE: loop exit
PB: predicated region body
PF: predicated region fallthrough
CT: control target
= control target key end

     0   :  { %9 = vsyncpa [#allocation4], 0  ;;  %s332_s0 = inlined_call_operand.hbm [shape: f32[128,128], index: 0, kind: input, shape index: {}]   ;;  %s333_s1 = inlined_call_operand.vmem [shape: f32[4,128], index: 1, kind: input, shape index: {}]   ;;  %s334_s2 = inlined_call_operand.<no memory space> [shape: f32[1], index: 2, kind: input, shape index: {}]   ;;  %s335_s3 = inlined_call_operand.hbm [shape: f32[1,4,128], index: 3, kind: output, shape index: {}]  }
   0x1   :  { %10 = vsyncpa [#allocation5], 0  ;;  %s275_s12 = smov [#allocation3]   ;;  %s227_s16 = scalar_lea.hbm %s332_s0, 2048 }
   0x2   :  { %s16_s13 = sshll.u32 %s275_s12, 4  ;;  %p228_p0 = scmp.ne.s32.totalorder %s332_s0, %s227_s16  ;;  %s17_s13 = int_to_ptr.vmem [resolvable:$true] %s16_s13 }
   0x3   :  { %p231_p1 = scmp.lt.u32.totalorder %s227_s16, %s332_s0 }
   0x5   :  { %p233_p2 = pnand %p231_p1, %p228_p0 }
   0x7   :  { %236 = shalt.err (!%p233_p2)
}
   0x8   :  { %s237_s21 = scalar_lea.vmem %s17_s13, 2048  ;;  %p242_p4 = scmp.lt.s32.totalorder %s17_s13, %s17_s13 }
   0x9   :  { %p238_p3 = scmp.ne.s32.totalorder %s17_s13, %s237_s21  ;;  %p243_p5 = scmp.lt.s32.totalorder %s237_s21, %s237_s21 }
   0xb   :  { %p244_p6 = por %p243_p5, %p242_p4 }
   0xd   :  { %p245_p7 = pnand %p244_p6, %p238_p3 }
   0xf   :  { %248 = shalt.err (!%p245_p7)
}
  0x10   :  { %s276_s22 = smov 128   ;;  %s277_s23 = smov 8  }
  0x11   :  { %22 = dma.hbm_to_vmem [thread:$0]  %s332_s0, 2048, %s17_s13, [#allocation4], %s276_s22, %s276_s22, %s277_s23  }
  0x12   :  { %271 = dma.done.wait [#allocation4], 2048  }
  0x13   :  { %272 = vsyncadd [#allocation4], 4294965248  ;;  %v278_v0 = vmov 0.0|0.0   ;;  %vm279_vm0 = vmmov 0   ;;  %v280_v1 = vmov 0.0   ;;  %v31_v2 = vld [vmem:[#allocation3] sm:$0xff]  ;;  %v48_v27 = vstv %s334_s2 }
  0x14   :  { %192 = vmatprep.subr.bf16.mxu0 %v278_v0  ;;  %189 = vmatprep.mubr.msk.f32.mxu0 %vm279_vm0, %v280_v1  ;;  %v32_v3 = vld [vmem:[#allocation3 + $0x8] sm:$0xff]  ;;  %v33_v5 = vld [vmem:[#allocation3 + $0x10] sm:$0xff]  ;;  %v34_v6 = vld [vmem:[#allocation3 + $0x18] sm:$0xff]  ;;  %s281_s29 = smov [#allocation6]  }
  0x15   :  { %v193_v4 = vpack.c.bf16 %v32_v3, %v31_v2  ;;  %v196_v7 = vpack.c.bf16 %v34_v6, %v33_v5  ;;  %v35_v8 = vld [vmem:[#allocation3 + $0x20] sm:$0xff]  ;;  %v36_v9 = vld [vmem:[#allocation3 + $0x28] sm:$0xff]  ;;  %v37_v11 = vld [vmem:[#allocation3 + $0x30] sm:$0xff]  ;;  %s131_s30 = sshll.u32 %s281_s29, 4  ;;  %s132_s30 = int_to_ptr.vmem [resolvable:$true] %s131_s30 }
  0x16   :  { %v199_v10 = vpack.c.bf16 %v36_v9, %v35_v8  ;;  %v38_v12 = vld [vmem:[#allocation3 + $0x38] sm:$0xff]  ;;  %v39_v14 = vld [vmem:[#allocation3 + $0x40] sm:$0xff]  ;;  %v40_v15 = vld [vmem:[#allocation3 + $0x48] sm:$0xff]  ;;  %p254_p9 = scmp.lt.s32.totalorder %s132_s30, %s132_s30 }
  0x17   :  { %194 = vmatpush3.bf16.xpose.msra.mxu0 %v193_v4  ;;  %v202_v13 = vpack.c.bf16 %v38_v12, %v37_v11  ;;  %v205_v16 = vpack.c.bf16 %v40_v15, %v39_v14  ;;  %v41_v17 = vld [vmem:[#allocation3 + $0x50] sm:$0xff]  ;;  %v42_v18 = vld [vmem:[#allocation3 + $0x58] sm:$0xff]  ;;  %v43_v20 = vld [vmem:[#allocation3 + $0x60] sm:$0xff] }
  0x18   :  { %195 = vmatprep.subr.bf16.mxu0 %v278_v0  ;;  %v208_v19 = vpack.c.bf16 %v42_v18, %v41_v17  ;;  %v44_v21 = vld [vmem:[#allocation3 + $0x68] sm:$0xff]  ;;  %v45_v23 = vld [vmem:[#allocation3 + $0x70] sm:$0xff]  ;;  %v46_v24 = vld [vmem:[#allocation3 + $0x78] sm:$0xff] }
  0x19   :  { %v211_v22 = vpack.c.bf16 %v44_v21, %v43_v20  ;;  %v214_v25 = vpack.c.bf16 %v46_v24, %v45_v23  ;;  %v30_v26 = vld [vmem:[%s333_s1] sm:$0xf]  ;;  %s249_s1 = scalar_lea.vmem %s132_s30, 64 }
  0x1a   :  { %p250_p8 = scmp.ne.s32.totalorder %s132_s30, %s249_s1  ;;  %p255_p10 = scmp.lt.s32.totalorder %s249_s1, %s249_s1 }
  0x1c   :  { %p256_p11 = por %p255_p10, %p254_p9 }
  0x1e   :  { %p257_p12 = pnand %p256_p11, %p250_p8 }
  0x1f   :  { %197 = vmatpush3.bf16.xpose.msra.mxu0 %v196_v7 }
  0x20   :  { %198 = vmatprep.subr.bf16.mxu0 %v278_v0 }
  0x27   :  { %200 = vmatpush3.bf16.xpose.msra.mxu0 %v199_v10 }
  0x28   :  { %201 = vmatprep.subr.bf16.mxu0 %v278_v0 }
  0x2f   :  { %203 = vmatpush3.bf16.xpose.msra.mxu0 %v202_v13 }
  0x30   :  { %204 = vmatprep.subr.bf16.mxu0 %v278_v0 }
  0x37   :  { %206 = vmatpush3.bf16.xpose.msra.mxu0 %v205_v16 }
  0x38   :  { %207 = vmatprep.subr.bf16.mxu0 %v278_v0 }
  0x3f   :  { %209 = vmatpush3.bf16.xpose.msra.mxu0 %v208_v19 }
  0x40   :  { %210 = vmatprep.subr.bf16.mxu0 %v278_v0 }
  0x47   :  { %212 = vmatpush3.bf16.xpose.msra.mxu0 %v211_v22 }
  0x48   :  { %213 = vmatprep.subr.bf16.mxu0 %v278_v0 }
  0x4f   :  { %215 = vmatpush3.bf16.xpose.msra.mxu0 %v214_v25 }
  0x56   :  { %190 = vmatmul.mubr.f32.vlgmr.msra.gmra.mrb[0].mxu0 %v30_v26 }
 0x129   :  { %v115_v28 = vpop.f32.mrb[0].mxu0 }
 0x12a   :  { %v116_v29 = vadd.f32 %v115_v28, %v48_v27  ;;  %v191_v30 = vpop.f32.mrb[1].mxu0 }
 0x12c   :  { %v119_v31 = vsub.f32 0.0, %v116_v29 }
 0x12e   :  { %v120_v32 = vmul.f32 1.442695, %v119_v31 }
 0x130   :  { %223 = vpow2.f32 %v120_v32 }
 0x13a   :  { %v224_v33 = vpop.eup %223 }
 0x13b   :  { %v122_v34 = vadd.f32 1.0, %v224_v33 }
 0x13d   :  { %225 = vrcp.f32 %v122_v34 }
 0x147   :  { %v226_v35 = vpop.eup %225 }
 0x148   :  { %124 = vst [vmem:[#allocation6] sm:$0xf] %v226_v35 }
 0x149   :  { %260 = shalt.err (!%p257_p12)
}
 0x14a   :  { %s261_s5 = scalar_lea.hbm %s335_s3, 64 }
 0x14b   :  { %p262_p13 = scmp.ne.s32.totalorder %s335_s3, %s261_s5  ;;  %p265_p0 = scmp.lt.u32.totalorder %s261_s5, %s335_s3 }
 0x14d   :  { %p267_p1 = pnand %p265_p0, %p262_p13 }
 0x14f   :  { %270 = shalt.err (!%p267_p1)
}
 0x150   :  { %134 = dma.vmem_to_hbm [thread:$0]  %s132_s30, 64, %s335_s3, [#allocation5]  }
 0x151   :  { %273 = dma.done.wait [#allocation5], 64  }
 0x152   :  { %274 = vsyncadd [#allocation5], 4294967232 }
 0x153   :  { %138 = vsyncpa [#allocation4], 1 }
 0x154   :  { %139 = vsyncpa [#allocation5], 1 }

</bundles_post_ra>
